<compile_context>
chip_gen: v5e
topology: v5e:2x2
jax: 0.10.0
libtpu: 0.0.40
codegen_flags: <defaults>
</compile_context>

<pallas_src>
import numpy as np
import jax
import jax.numpy as jnp
from jax.experimental import pallas as pl
from jax.experimental.pallas import tpu as pltpu


def _round_up(x, m):
    return ((x + m - 1) // m) * m


def _ensemble_kernel(x_ref, m_ref, b_ref, aa_ref, o_ref):
    """out = sigmoid(x @ M + b) @ agent_actions   (M = folded conv1+fc1+fc2, lane-padded)."""
    x = x_ref[...].astype(jnp.float32)                      # free in-VMEM upcast if x is bf16
    y = jnp.dot(x, m_ref[...], preferred_element_type=jnp.float32) + b_ref[...]
    sig = 1.0 / (1.0 + jnp.exp(-y))
    o_ref[...] = jnp.dot(sig, aa_ref[...], preferred_element_type=jnp.float32)


def fold_params(params):
    """Fold conv1 -> flatten -> fc1 -> fc2 into one (K, A_pad) matrix + (1, A_pad) bias.

    Consecutive affine maps compose exactly.  Computed once per parameter set with plain XLA
    (outside the kernel hot path); cache the result across forward calls.  The ensemble dim
    is zero-padded to a multiple of 128 (exact, see module docstring).
    """
    cw = params["conv_w"].astype(jnp.float32)          # (A, T, S), out-channel (=1) squeezed
    A, T, S = cw.shape
    K = A * T * S
    # PyTorch Conv2d(padding='same') asymmetric padding: (k-1)//2 before, remainder after.
    pad_t = ((T - 1) // 2, (T - 1) - (T - 1) // 2)
    pad_s = ((S - 1) // 2, (S - 1) - (S - 1) // 2)
    # Express the conv as an explicit linear map by running it on the K identity-basis inputs.
    eye = jnp.eye(K, dtype=jnp.float32).reshape(K, A, T, S)
    w_conv = jax.lax.conv_general_dilated(
        eye, cw[None], window_strides=(1, 1), padding=(pad_t, pad_s),
        dimension_numbers=("NCHW", "OIHW", "NCHW")).reshape(K, T * S)   # (K, T*S)
    w1t = params["fc1_w"].astype(jnp.float32).T        # (T*S, H)
    w2t = params["fc2_w"].astype(jnp.float32).T        # (H, A_out)
    cb = params["conv_b"].astype(jnp.float32)[0]
    b1 = params["fc1_b"].astype(jnp.float32)
    b2 = params["fc2_b"].astype(jnp.float32)
    m_fused = w_conv @ w1t @ w2t                                         # (K, A_out)
    b_fused = (cb * jnp.sum(w1t, axis=0) + b1) @ w2t + b2                # (A_out,)

    A_out = m_fused.shape[1]
    A_pad = _round_up(max(A_out, 128), 128)
    m_pad = jnp.zeros((K, A_pad), jnp.float32).at[:, :A_out].set(m_fused)
    b_pad = jnp.zeros((1, A_pad), jnp.float32).at[:, :A_out].set(b_fused[None])
    return {"m": m_pad, "b": b_pad, "K": K, "A_out": A_out, "A_pad": A_pad,
            "A": A, "T": T, "S": S}


def prepare_agent_actions(agent_actions, folded):
    """Zero-pad per-agent Q-values to (A_pad, n_actions) f32 (exact: sigmoid(0) * 0 = 0).

    Hoisted out of the per-call path; cache alongside the folded weights when the same
    state / Q-values are reused.
    """
    A_out, n_act = agent_actions.shape
    aa = jnp.zeros((folded["A_pad"], n_act), jnp.float32)
    return aa.at[:A_out].set(agent_actions.astype(jnp.float32))


def _choose_tile(B, bytes_per_row):
    """Fixed-size batch tile: big enough to amortize per-step overhead, VMEM-safe on v7x."""
    tb = min(1024, _round_up(B, 8))
    # Keep >= 2 grid steps for large batches so both v7x TensorCores get work.
    if B > 128 and pl.cdiv(B, tb) < 2:
        tb = _round_up(pl.cdiv(B, 2), 8)
    # Cap the double-buffered x+out working set (v7x: 64 MiB physical / 32 MiB scoped VMEM).
    while tb > 8 and 2 * tb * bytes_per_row > (12 << 20):
        tb = max(8, _round_up(tb // 2, 8))
    return tb


def ensemble_q_forward(x, aa_padded, folded, *, min_pallas_batch=65):
    """Weighted-actions ensemble forward: sigmoid(fc2(fc1(flatten(conv1(x))))) @ agent_actions.

    x: (A, T, S) single trajectory tensor (module's batch-of-1 semantics) or (B, A, T, S).
       f32 or bf16 (bf16 is upcast to f32 in VMEM inside the kernel; no wrapper-side cast).
    aa_padded: prepare_agent_actions(...) output, (A_pad, n_actions) f32.
    folded:    fold_params(...) output.
    """
    K, A_pad = folded["K"], folded["A_pad"]
    m, b = folded["m"], folded["b"]
    n_act = aa_padded.shape[1]

    squeeze = x.ndim == 3
    xb = x[None] if squeeze else x                     # (B, A, T, S)
    B = xb.shape[0]
    x_flat = xb.reshape(B, K)                          # contiguous reshape, keeps input dtype

    if B < min_pallas_batch:
        # Tiny batch (incl. the module's single-trajectory call): pallas_call launch and
        # pipeline prologue would dominate a few kFLOPs -> same folded math in plain XLA.
        y = x_flat.astype(jnp.float32) @ m + b
        out = (1.0 / (1.0 + jnp.exp(-y))) @ aa_padded
    else:
        x_bytes = x_flat.dtype.itemsize
        tb = _choose_tile(B, K * x_bytes + n_act * 4)
        grid = (pl.cdiv(B, tb),)
        cost = pl.CostEstimate(
            flops=2 * B * K * A_pad + 2 * B * A_pad * n_act,
            transcendentals=B * A_pad,
            bytes_accessed=B * K * x_bytes + B * n_act * 4
                           + m.size * 4 + b.size * 4 + aa_padded.size * 4,
        )
        out = pl.pallas_call(
            _ensemble_kernel,
            out_shape=jax.ShapeDtypeStruct((B, n_act), jnp.float32),
            grid=grid,
            in_specs=[
                pl.BlockSpec((tb, K), lambda i: (i, 0)),         # x: tiled over batch
                pl.BlockSpec((K, A_pad), lambda i: (0, 0)),      # folded weight (resident)
                pl.BlockSpec((1, A_pad), lambda i: (0, 0)),      # folded bias
                pl.BlockSpec((A_pad, n_act), lambda i: (0, 0)),  # padded agent_actions
            ],
            out_specs=pl.BlockSpec((tb, n_act), lambda i: (i, 0)),
            compiler_params=pltpu.CompilerParams(dimension_semantics=("parallel",)),
            cost_estimate=cost,
        )(x_flat, m, b, aa_padded)

    return out[0:1] if squeeze else out


def init_params(key, A, T, S, action_space, weighted_actions=True):
    """Deterministic synthetic params matching nn.Module shapes (out-channel of conv squeezed)."""
    ks = jax.random.split(key, 6)
    out2 = A if weighted_actions else action_space
    return {
        "conv_w": 0.1 * jax.random.normal(ks[0], (A, T, S), jnp.float32),   # conv1.weight (1,A,T,S)
        "conv_b": 0.1 * jax.random.normal(ks[1], (1,), jnp.float32),        # conv1.bias (1,)
        "fc1_w": 0.1 * jax.random.normal(ks[2], (S, T * S), jnp.float32),   # fc1.weight (S, T*S)
        "fc1_b": 0.1 * jax.random.normal(ks[3], (S,), jnp.float32),         # fc1.bias (S,)
        "fc2_w": 0.1 * jax.random.normal(ks[4], (out2, S), jnp.float32),    # fc2.weight
        "fc2_b": 0.1 * jax.random.normal(ks[5], (out2,), jnp.float32),      # fc2.bias
    }


def reference_forward(x, agent_actions, params):
    """Pure-JAX reference with the same semantics as the PyTorch forward (weighted branch)."""
    A, T, S = x.shape
    pad_t = ((T - 1) // 2, (T - 1) - (T - 1) // 2)
    pad_s = ((S - 1) // 2, (S - 1) - (S - 1) // 2)
    out = jax.lax.conv_general_dilated(
        x[None], params["conv_w"][None],
        window_strides=(1, 1), padding=(pad_t, pad_s),
        dimension_numbers=("NCHW", "OIHW", "NCHW"))
    out = out + params["conv_b"].reshape(1, 1, 1, 1)
    flat = out.reshape(1, -1)
    h = flat @ params["fc1_w"].T + params["fc1_b"]
    y = h @ params["fc2_w"].T + params["fc2_b"]
    return jax.nn.sigmoid(y) @ agent_actions


if __name__ == "__main__":
    # agents=4, state_space=16, trajectory_depth=3, action_space=4, weighted_actions=True
    A, S, T, action_space = 4, 16, 3, 4
    B = 200            # batched Pallas path: 2 grid steps (v7x megacore) incl. a partial block

    key = jax.random.PRNGKey(0)
    kx, ka, kp = jax.random.split(key, 3)
    xb = jax.random.uniform(kx, (B, A, T, S), jnp.float32)          # synthetic trajectories
    agent_actions = jax.random.uniform(ka, (A, action_space), jnp.float32)
    params = init_params(kp, A, T, S, action_space, weighted_actions=True)

    folded = fold_params(params)                       # one-time param fold (cacheable)
    aa_padded = prepare_agent_actions(agent_actions, folded)

    ref_one = lambda xi: reference_forward(xi, agent_actions, params)[0]   # (n_act,)
    refB = jax.vmap(ref_one)(xb)                                           # (B, n_act)

    # 1) Module-equivalent single-trajectory forward (batch of 1; small-batch XLA fast path).
    out1 = jax.block_until_ready(ensemble_q_forward(xb[0], aa_padded, folded))
    assert out1.shape == (1, action_space)
    np.testing.assert_allclose(np.asarray(out1[0]), np.asarray(refB[0]), rtol=1e-4, atol=1e-4)

    # 2) Batched forward through the Pallas kernel (f32 trajectories).
    outB = jax.block_until_ready(ensemble_q_forward(xb, aa_padded, folded))
    assert outB.shape == (B, action_space)
    np.testing.assert_allclose(np.asarray(outB), np.asarray(refB), rtol=1e-4, atol=1e-4)

    # 3) Batched forward with x produced upstream in bf16 (halved HBM read; upcast in VMEM).
    outBh = jax.block_until_ready(
        ensemble_q_forward(xb.astype(jnp.bfloat16), aa_padded, folded))
    np.testing.assert_allclose(np.asarray(outBh), np.asarray(refB), rtol=5e-2, atol=5e-2)

    print("KERNEL_OK")
</pallas_src>

<mosaic_0001>
module attributes {stable_mosaic.version = 11 : i64} {
  func.func @_ensemble_kernel(%arg0: i32, %arg1: memref<104x192xf32, #tpu.memory_space<vmem>>, %arg2: memref<192x128xf32, #tpu.memory_space<vmem>>, %arg3: memref<1x128xf32, #tpu.memory_space<vmem>>, %arg4: memref<128x4xf32, #tpu.memory_space<vmem>>, %arg5: memref<104x4xf32, #tpu.memory_space<vmem>>) attributes {dimension_semantics = [#tpu.dimension_semantics<parallel>], iteration_bounds = array<i64: 2>, scalar_prefetch = 0 : i64, scratch_operands = 0 : i64, tpu.core_type = #tpu.core_type<tc>, window_params = [{transform_indices = @transform_0, window_bounds = array<i64: 104, 192>}, {pipeline_mode = #tpu.pipeline_mode<synchronous>, transform_indices = @transform_1, window_bounds = array<i64: 192, 128>}, {pipeline_mode = #tpu.pipeline_mode<synchronous>, transform_indices = @transform_2, window_bounds = array<i64: 1, 128>}, {pipeline_mode = #tpu.pipeline_mode<synchronous>, transform_indices = @transform_3, window_bounds = array<i64: 128, 4>}, {transform_indices = @transform_4, window_bounds = array<i64: 104, 4>}]} {
    %c0 = arith.constant 0 : index
    %c0_0 = arith.constant 0 : index
    %0 = vector.load %arg1[%c0, %c0_0] : memref<104x192xf32, #tpu.memory_space<vmem>>, vector<104x192xf32>
    %c0_1 = arith.constant 0 : index
    %c0_2 = arith.constant 0 : index
    %1 = vector.load %arg2[%c0_1, %c0_2] : memref<192x128xf32, #tpu.memory_space<vmem>>, vector<192x128xf32>
    %cst = arith.constant dense<0.000000e+00> : vector<104x128xf32>
    %2 = tpu.matmul %0, %1, %cst {dimension_numbers = #tpu.dot_dimension_numbers<[1], [0], [0], [1], [0, 0, 1, 1], [], []>} : vector<104x192xf32>, vector<192x128xf32>, vector<104x128xf32> -> vector<104x128xf32>
    %c0_3 = arith.constant 0 : index
    %c0_4 = arith.constant 0 : index
    %3 = vector.load %arg3[%c0_3, %c0_4] : memref<1x128xf32, #tpu.memory_space<vmem>>, vector<1x128xf32>
    %4 = vector.broadcast %3 : vector<1x128xf32> to vector<104x128xf32>
    %5 = arith.addf %2, %4 : vector<104x128xf32>
    %cst_5 = arith.constant 0.000000e+00 : f32
    %6 = vector.broadcast %cst_5 : f32 to vector<104x128xf32>
    %7 = arith.subf %6, %5 : vector<104x128xf32>
    %8 = math.exp %7 : vector<104x128xf32>
    %cst_6 = arith.constant 1.000000e+00 : f32
    %9 = vector.broadcast %cst_6 : f32 to vector<104x128xf32>
    %10 = arith.addf %9, %8 : vector<104x128xf32>
    %cst_7 = arith.constant 1.000000e+00 : f32
    %11 = vector.broadcast %cst_7 : f32 to vector<104x128xf32>
    %12 = arith.divf %11, %10 : vector<104x128xf32>
    %c0_8 = arith.constant 0 : index
    %c0_9 = arith.constant 0 : index
    %13 = vector.load %arg4[%c0_8, %c0_9] : memref<128x4xf32, #tpu.memory_space<vmem>>, vector<128x4xf32>
    %cst_10 = arith.constant dense<0.000000e+00> : vector<104x4xf32>
    %14 = tpu.matmul %12, %13, %cst_10 {dimension_numbers = #tpu.dot_dimension_numbers<[1], [0], [0], [1], [0, 0, 1, 1], [], []>} : vector<104x128xf32>, vector<128x4xf32>, vector<104x4xf32> -> vector<104x4xf32>
    %c0_11 = arith.constant 0 : index
    %c0_12 = arith.constant 0 : index
    %15 = vector.load %arg5[%c0_11, %c0_12] : memref<104x4xf32, #tpu.memory_space<vmem>>, vector<104x4xf32>
    tpu.vector_store %arg5[%c0_11, %c0_12], %14 {strides = array<i32>} : memref<104x4xf32, #tpu.memory_space<vmem>>, vector<104x4xf32>,
    return
  }
  func.func @transform_0(%arg0: i32) -> (i32, i32) {
    %c0_i32 = arith.constant 0 : i32
    %c0_i32_0 = arith.constant 0 : i32
    return %arg0, %c0_i32 : i32, i32
  }
  func.func @transform_1(%arg0: i32) -> (i32, i32) {
    %c0_i32 = arith.constant 0 : i32
    %c0_i32_0 = arith.constant 0 : i32
    %c0_i32_1 = arith.constant 0 : i32
    return %c0_i32, %c0_i32_0 : i32, i32
  }
  func.func @transform_2(%arg0: i32) -> (i32, i32) {
    %c0_i32 = arith.constant 0 : i32
    %c0_i32_0 = arith.constant 0 : i32
    %c0_i32_1 = arith.constant 0 : i32
    return %c0_i32, %c0_i32_0 : i32, i32
  }
  func.func @transform_3(%arg0: i32) -> (i32, i32) {
    %c0_i32 = arith.constant 0 : i32
    %c0_i32_0 = arith.constant 0 : i32
    %c0_i32_1 = arith.constant 0 : i32
    return %c0_i32, %c0_i32_0 : i32, i32
  }
  func.func @transform_4(%arg0: i32) -> (i32, i32) {
    %c0_i32 = arith.constant 0 : i32
    %c0_i32_0 = arith.constant 0 : i32
    return %arg0, %c0_i32 : i32, i32
  }
}

</mosaic_0001>

<bundles_post_ra>
// kernel: tpu_custom_call.1
= control target key start
LH: loop header
LB: loop body
LE: loop exit
PB: predicated region body
PF: predicated region fallthrough
CT: control target
= control target key end

     0   :  { %s1359_s15 = smov 0   ;;  %s1361_s16 = smov 0   ;;  %s1753_s0 = inlined_call_operand.vmem [shape: f32[200,192], index: 0, kind: input, shape index: {}]   ;;  %s1754_s1 = inlined_call_operand.vmem [shape: f32[192,128], index: 1, kind: input, shape index: {}]   ;;  %s1755_s2 = inlined_call_operand.vmem [shape: f32[1,128], index: 2, kind: input, shape index: {}]   ;;  %s1756_s3 = inlined_call_operand.vmem [shape: f32[128,4], index: 3, kind: input, shape index: {}]   ;;  %s1757_s4 = inlined_call_operand.vmem [shape: f32[200,4], index: 4, kind: output, shape index: {}]  }
   0x1   :  { %s1363_s17 = smov 0  }
   0x2 LB: > { %s1372_s18 = sadd.s32 4294967295, %s1300_s17   ;;  %s1374_s19 = sadd.s32 1, %s1300_s17   ;;  %s1300_s17 = sphi %s1363_s17, %s1766_s17   ;;  %s1296_s16 = sphi %s1361_s16, %s1765_s16   ;;  %s1292_s15 = sphi %s1359_s15, %s1764_s15  }
   0x3   : > { %s107_s20 = ssub.s32 %s1300_s17, %s1374_s19  ;;  %s110_s21 = sadd.s32 1, %s1296_s16 }
   0x4   : > { %p108_p0 = scmp.eq.s32.totalorder %s107_s20, 0  ;;  %p120_p1 = scmp.ne.s32.totalorder %s1296_s16, %s1292_s15 }
   0x5   : > { %p121_p2 = scmp.eq.s32.totalorder %s1372_s18, 1  ;;  %p1035_p3 = scmp.ge.s32.totalorder %s1300_s17, 1 }
   0x6   : > { %s1382_s22 = scalar_select %p108_p0, %s1296_s16, %s110_s21  }
   0x7   : > { %p1384_p4 = por %p121_p2, %p120_p1  ;;  %p174_p5 = scmp.lt.s32.totalorder %s1300_s17, 3 }
   0x9   : > { %p175_p6 = pnand %p1035_p3, %p174_p5 }
   0xa   : > { %s1398_s30 = smul.u32 (!%p175_p6), 13, %s1372_s18  ;;  %s202_s10 = sand.u32 (!%p175_p6), 1, %s1292_s15  }
   0xb   : > { %178 = sbr.rel (%p175_p6) target bundleno = 480 (0x1e0), region = 36 }
   0xc   : > { %p211_p7 = scmp.lt.s32.totalorder (!%p175_p6), %s1398_s30, 24  ;;  %s1097_s11 = smul.u32 (!%p175_p6), 104, %s202_s10 }
   0xe   : > { %s1632_s13 = scalar_lea.vmem (!%p175_p6), [#allocation2], %s1097_s11  }
  0x10   : > { %v268_v0 = vld [vmem:[%s1754_s1 + $0x78] sm:$0xff]  ;;  %v267_v2 = vld [vmem:[%s1754_s1 + $0x70] sm:$0xff]  ;;  %v266_v4 = vld [vmem:[%s1754_s1 + $0x68] sm:$0xff]  ;;  %s212_s17 = scalar_select %p211_p7, %s1398_s30, 24  ;;  %vm281_vm0 = vcmask 523264  }
  0x11   : > { %v276_v1 = vld [vmem:[%s1754_s1 + $0xb8] sm:$0xff]  ;;  %321 = vmatpush.msra.mxu0 %v268_v0  ;;  %v275_v3 = vld [vmem:[%s1754_s1 + $0xb0] sm:$0xff]  ;;  %v274_v5 = vld [vmem:[%s1754_s1 + $0xa8] sm:$0xff]  ;;  %1065 = vmatpush.msra.mxu3 %v268_v0  ;;  %s774_s15 = ssub.s32 (%p1384_p4), 25, %s1398_s30  ;;  %s1064_s14 = smul.u32 (%p1384_p4), 104, %s1372_s18 }
  0x12   : > { %385 = vmatpush.msra.mxu1 %v276_v1  ;;  %v265_v6 = vld [vmem:[%s1754_s1 + $0x60] sm:$0xff]  ;;  %v264_v8 = vld [vmem:[%s1754_s1 + $0x58] sm:$0xff]  ;;  %s1063_s26 = sshll.u32 %s212_s17, 4  ;;  %v263_v10 = vld [vmem:[%s1754_s1 + $0x50] sm:$0xff]  ;;  %p775_p8 = scmp.lt.s32.totalorder (%p1384_p4), %s774_s15, 13 }
  0x13   : > { %322 = vmatpush.msra.mxu0 %v267_v2  ;;  %v273_v7 = vld [vmem:[%s1754_s1 + $0xa0] sm:$0xff]  ;;  %1066 = vmatpush.msra.mxu3 %v267_v2  ;;  %v272_v9 = vld [vmem:[%s1754_s1 + $0x98] sm:$0xff]  ;;  %v271_v11 = vld [vmem:[%s1754_s1 + $0x90] sm:$0xff]  ;;  %s1438_s12 = scalar_lea.vmem %s1753_s0, %s1063_s26  ;;  %s1667_s21 = scalar_lea.vmem (%p1384_p4), %s1757_s4, %s1064_s14  }
  0x14   : > { %386 = vmatpush.msra.mxu1 %v275_v3  ;;  %v262_v12 = vld [vmem:[%s1754_s1 + $0x48] sm:$0xff]  ;;  %v261_v14 = vld [vmem:[%s1754_s1 + $0x40] sm:$0xff]  ;;  %v260_v17 = vld [vmem:[%s1754_s1 + $0x38] sm:$0xff] }
  0x15   : > { %323 = vmatpush.msra.mxu0 %v266_v4  ;;  %1067 = vmatpush.msra.mxu3 %v266_v4  ;;  %v270_v13 = vld [vmem:[%s1754_s1 + $0x88] sm:$0xff]  ;;  %v269_v15 = vld [vmem:[%s1754_s1 + $0x80] sm:$0xff]  ;;  %v259_v18 = vld [vmem:[%s1754_s1 + $0x30] sm:$0xff] }
  0x16   : > { %387 = vmatpush.msra.mxu1 %v274_v5  ;;  %v228_v16 = vld [vmem:[%s1438_s12 + $0x8] sm:$0xff]  ;;  %v257_v20 = vld [vmem:[%s1754_s1 + $0x20] sm:$0xff]  ;;  %v230_v21 = vld [vmem:[%s1438_s12 + $0x18] sm:$0xff] }
  0x17   : > { %324 = vmatpush.msra.mxu0 %v265_v6  ;;  %1068 = vmatpush.msra.mxu3 %v265_v6  ;;  %v258_v19 = vld [vmem:[%s1754_s1 + $0x28] sm:$0xff]  ;;  %v256_v22 = vld [vmem:[%s1754_s1 + $0x18] sm:$0xff]  ;;  %v255_v23 = vld [vmem:[%s1754_s1 + $0x10] sm:$0xff] }
  0x18   : > { %388 = vmatpush.msra.mxu1 %v273_v7  ;;  %v254_v24 = vld [vmem:[%s1754_s1 + $0x8] sm:$0xff]  ;;  %v253_v25 = vld [vmem:[%s1754_s1] sm:$0xff]  ;;  %v229_v28 = vld [vmem:[%s1438_s12 + $0x10] sm:$0xff] }
  0x19   : > { %325 = vmatpush.msra.mxu0 %v264_v8  ;;  %1069 = vmatpush.msra.mxu3 %v264_v8  ;;  %v227_v26 = vld [vmem:[%s1438_s12] sm:$0xff]  ;;  %v232_v27 = vld [vmem:[%s1438_s12 + $0x28] sm:$0xff]  ;;  %v234_v29 = vld [vmem:[%s1438_s12 + $0x38] sm:$0xff] }
  0x1a   : > { %389 = vmatpush.msra.mxu1 %v272_v9  ;;  %v231_v30 = vld [vmem:[%s1438_s12 + $0x20] sm:$0xff]  ;;  %v236_v31 = vld [vmem:[%s1438_s12 + $0x48] sm:$0xff]  ;;  %v233_v32 = vld [vmem:[%s1438_s12 + $0x30] sm:$0xff] }
  0x1b   : > { %326 = vmatpush.msra.mxu0 %v263_v10  ;;  %1070 = vmatpush.msra.mxu3 %v263_v10  ;;  %v238_v33 = vld [vmem:[%s1438_s12 + $0x58] sm:$0xff]  ;;  %v247_v34 = vld [vmem:[%s1438_s12 + $0xa0] sm:$0xff]  ;;  %v240_v36 = vld [vmem:[%s1438_s12 + $0x68] sm:$0xff] }
  0x1c   : > { %390 = vmatpush.msra.mxu1 %v271_v11  ;;  %v235_v35 = vld [vmem:[%s1438_s12 + $0x40] sm:$0xff]  ;;  %v249_v37 = vld [vmem:[%s1438_s12 + $0xb0] sm:$0xff]  ;;  %v242_v39 = vld [vmem:[%s1438_s12 + $0x78] sm:$0xff] }
  0x1d   : > { %327 = vmatpush.msra.mxu0 %v262_v12  ;;  %1071 = vmatpush.msra.mxu3 %v262_v12  ;;  %v237_v38 = vld [vmem:[%s1438_s12 + $0x50] sm:$0xff]  ;;  %v251_v40 = vld [vmem:[%s1438_s12 + $0xc0] sm:$0xff]  ;;  %v244_v42 = vld [vmem:[%s1438_s12 + $0x88] sm:$0xff] }
  0x1e   : > { %391 = vmatpush.msra.mxu1 %v270_v13  ;;  %v239_v41 = vld [vmem:[%s1438_s12 + $0x60] sm:$0xff]  ;;  %v241_v43 = vld [vmem:[%s1438_s12 + $0x70] sm:$0xff]  ;;  %v246_v44 = vld [vmem:[%s1438_s12 + $0x98] sm:$0xff] }
  0x1f   : > { %328 = vmatpush.msra.mxu0 %v261_v14  ;;  %1072 = vmatpush.msra.mxu3 %v261_v14  ;;  %v243_v45 = vld [vmem:[%s1438_s12 + $0x80] sm:$0xff]  ;;  %v248_v46 = vld [vmem:[%s1438_s12 + $0xa8] sm:$0xff]  ;;  %v245_v47 = vld [vmem:[%s1438_s12 + $0x90] sm:$0xff] }
  0x20   : > { %392 = vmatpush.msra.mxu1 %v269_v15  ;;  %v250_v48 = vld [vmem:[%s1438_s12 + $0xb8] sm:$0xff]  ;;  %v252_v49 = vld [vmem:[%s1438_s12 + $0xc8] sm:$0xff]  ;;  %v694_v51 = vld [vmem:[%s1756_s3 + $0x70] sm:$0xff] }
  0x21   : > { %1038 = vmatmul.msk.f32.vlgmr.msra.gmra.mxu1 %vm281_vm0, %v228_v16  ;;  %329 = vmatpush.msra.mxu0 %v260_v17  ;;  %v695_v50 = vld [vmem:[%s1756_s3 + $0x78] sm:$0xff]  ;;  %v693_v52 = vld [vmem:[%s1756_s3 + $0x68] sm:$0xff]  ;;  %v692_v53 = vld [vmem:[%s1756_s3 + $0x60] sm:$0xff] }
  0x22   : > { %1073 = vmatpush.msra.mxu3 %v260_v17  ;;  %696 = vmatpush.msra.mxu2 %v695_v50  ;;  %v691_v54 = vld [vmem:[%s1756_s3 + $0x58] sm:$0xff]  ;;  %v690_v55 = vld [vmem:[%s1756_s3 + $0x50] sm:$0xff]  ;;  %v689_v56 = vld [vmem:[%s1756_s3 + $0x48] sm:$0xff] }
  0x23   : > { %330 = vmatpush.msra.mxu0 %v259_v18  ;;  %v688_v58 = vld [vmem:[%s1756_s3 + $0x40] sm:$0xff]  ;;  %v687_v59 = vld [vmem:[%s1756_s3 + $0x38] sm:$0xff]  ;;  %v686_v60 = vld [vmem:[%s1756_s3 + $0x30] sm:$0xff] }
  0x24   : > { %1074 = vmatpush.msra.mxu3 %v259_v18  ;;  %697 = vmatpush.msra.mxu2 %v694_v51  ;;  %v685_v61 = vld [vmem:[%s1756_s3 + $0x28] sm:$0xff]  ;;  %v684_v63 = vld [vmem:[%s1756_s3 + $0x20] sm:$0xff]  ;;  %v683_v0 = vld [vmem:[%s1756_s3 + $0x18] sm:$0xff] }
  0x25   : > { %331 = vmatpush.msra.mxu0 %v258_v19  ;;  %v1551_v1 = vld [vmem:[%s1755_s2] ss:$0 sm:$0xff]  ;;  %v682_v2 = vld [vmem:[%s1756_s3 + $0x10] sm:$0xff]  ;;  %v681_v3 = vld [vmem:[%s1756_s3 + $0x8] sm:$0xff] }
  0x26   : > { %1075 = vmatpush.msra.mxu3 %v258_v19  ;;  %698 = vmatpush.msra.mxu2 %v693_v52  ;;  %v680_v7 = vld [vmem:[%s1756_s3] sm:$0xff] }
  0x27   : > { %332 = vmatpush.msra.mxu0 %v257_v20 }
  0x28   : > { %1076 = vmatpush.msra.mxu3 %v257_v20  ;;  %699 = vmatpush.msra.mxu2 %v692_v53 }
  0x29   : > { %1039 = vmatmul.msk.f32.gmra.mxu1 %vm281_vm0, %v230_v21  ;;  %333 = vmatpush.msra.mxu0 %v256_v22 }
  0x2a   : > { %1077 = vmatpush.msra.mxu3 %v256_v22  ;;  %700 = vmatpush.msra.mxu2 %v691_v54 }
  0x2b   : > { %334 = vmatpush.msra.mxu0 %v255_v23 }
  0x2c   : > { %1078 = vmatpush.msra.mxu3 %v255_v23  ;;  %701 = vmatpush.msra.mxu2 %v690_v55 }
  0x2d   : > { %335 = vmatpush.msra.mxu0 %v254_v24 }
  0x2e   : > { %1079 = vmatpush.msra.mxu3 %v254_v24  ;;  %702 = vmatpush.msra.mxu2 %v689_v56 }
  0x2f   : > { %336 = vmatpush.msra.mxu0 %v253_v25 }
  0x30   : > { %337 = vmatmul.f32.vlgmr.msra.gmra.mxu0 %v227_v26  ;;  %1080 = vmatpush.msra.mxu3 %v253_v25 }
  0x31   : > { %1040 = vmatmul.msk.f32.gmra.mxu1 %vm281_vm0, %v232_v27  ;;  %367 = vmatmul.f32.vlgmr.msra.gmra.mxu3 %v247_v34 }
  0x32   : > { %1081 = vmatpush.msrb.mxu3 %v695_v50  ;;  %703 = vmatpush.msra.mxu2 %v688_v58 }
  0x34   : > { %1082 = vmatpush.msrb.mxu3 %v694_v51  ;;  %704 = vmatpush.msra.mxu2 %v687_v59 }
  0x36   : > { %1083 = vmatpush.msrb.mxu3 %v693_v52  ;;  %705 = vmatpush.msra.mxu2 %v686_v60 }
  0x38   : > { %340 = vmatmul.f32.gmra.mxu0 %v229_v28  ;;  %1084 = vmatpush.msrb.mxu3 %v692_v53 }
  0x39   : > { %1041 = vmatmul.msk.f32.gmra.mxu1 %vm281_vm0, %v234_v29  ;;  %370 = vmatmul.f32.gmra.mxu3 %v249_v37 }
  0x3a   : > { %1085 = vmatpush.msrb.mxu3 %v691_v54  ;;  %706 = vmatpush.msra.mxu2 %v685_v61 }
  0x3c   : > { %1086 = vmatpush.msrb.mxu3 %v690_v55  ;;  %707 = vmatpush.msra.mxu2 %v684_v63 }
  0x3e   : > { %1087 = vmatpush.msrb.mxu3 %v689_v56  ;;  %708 = vmatpush.msra.mxu2 %v683_v0 }
  0x40   : > { %343 = vmatmul.f32.gmra.mxu0 %v231_v30  ;;  %1088 = vmatpush.msrb.mxu3 %v688_v58 }
  0x41   : > { %1042 = vmatmul.msk.f32.gmra.mxu1 %vm281_vm0, %v236_v31  ;;  %373 = vmatmul.f32.gmra.mxu3 %v251_v40 }
  0x42   : > { %1089 = vmatpush.msrb.mxu3 %v687_v59  ;;  %709 = vmatpush.msra.mxu2 %v682_v2 }
  0x44   : > { %1090 = vmatpush.msrb.mxu3 %v686_v60  ;;  %710 = vmatpush.msra.mxu2 %v681_v3 }
  0x46   : > { %1091 = vmatpush.msrb.mxu3 %v685_v61  ;;  %711 = vmatpush.msra.mxu2 %v680_v7 }
  0x48   : > { %346 = vmatmul.f32.gmra.mxu0 %v233_v32  ;;  %1092 = vmatpush.msrb.mxu3 %v684_v63 }
  0x49   : > { %1043 = vmatmul.msk.f32.gmra.mxu1 %vm281_vm0, %v238_v33 }
  0x4a   : > { %1093 = vmatpush.msrb.mxu3 %v683_v0 }
  0x4c   : > { %1094 = vmatpush.msrb.mxu3 %v682_v2 }
  0x4e   : > { %1095 = vmatpush.msrb.mxu3 %v681_v3 }
  0x50   : > { %349 = vmatmul.f32.gmra.mxu0 %v235_v35  ;;  %1096 = vmatpush.msrb.mxu3 %v680_v7 }
  0x51   : > { %1044 = vmatmul.msk.f32.gmra.mxu1 %vm281_vm0, %v240_v36 }
  0x58   : > { %352 = vmatmul.f32.gmra.mxu0 %v237_v38 }
  0x59   : > { %1045 = vmatmul.msk.f32.gmra.mxu1 %vm281_vm0, %v242_v39 }
  0x60   : > { %355 = vmatmul.f32.gmra.mxu0 %v239_v41 }
  0x61   : > { %1046 = vmatmul.msk.f32.gmra.mxu1 %vm281_vm0, %v244_v42 }
  0x68   : > { %358 = vmatmul.f32.gmra.mxu0 %v241_v43 }
  0x69   : > { %1047 = vmatmul.msk.f32.gmra.mxu1 %vm281_vm0, %v246_v44 }
  0x70   : > { %361 = vmatmul.f32.gmra.mxu0 %v243_v45 }
  0x71   : > { %1048 = vmatmul.msk.f32.gmra.mxu1 %vm281_vm0, %v248_v46 }
  0x78   : > { %364 = vmatmul.f32.gmra.mxu0 %v245_v47 }
  0x79   : > { %1049 = vmatmul.msk.f32.gmra.mxu1 %vm281_vm0, %v250_v48 }
  0x81   : > { %1050 = vmatmul.msk.f32.gmra.mxu1 %vm281_vm0, %v252_v49 }
  0x9e   : > { %v394_v57 = vpop.f32.mrf.mxu1 }
  0xa6   : > { %v397_v62 = vpop.f32.mrf.mxu1 }
  0xad   : > { %v338_v4 = vpop.f32.mrf.mxu0 }
  0xae   : > { %v400_v5 = vpop.f32.mrf.mxu1  ;;  %v339_v6 = vadd.f32 %v1551_v1, %v338_v4 }
  0xb0   : > { %v395_v8 = vadd.f32 %v394_v57, %v339_v6 }
  0xb2   : > { %v433_v9 = vsub.f32 0.0, %v395_v8 }
  0xb4   : > { %v446_v10 = vmul.f32 1.442695, %v433_v9 }
  0xb5   : > { %v341_v11 = vpop.f32.mrf.mxu0 }
  0xb6   : > { %v403_v12 = vpop.f32.mrf.mxu1  ;;  %1188 = vpow2.f32 %v446_v10  ;;  %v342_v13 = vadd.f32 %v1551_v1, %v341_v11 }
  0xb8   : > { %v398_v14 = vadd.f32 %v397_v62, %v342_v13 }
  0xba   : > { %v434_v15 = vsub.f32 0.0, %v398_v14 }
  0xbc   : > { %v1189_v16 = vpop.eup %1188  ;;  %v448_v17 = vmul.f32 1.442695, %v434_v15 }
  0xbd   : > { %v472_v18 = vadd.f32 1.0, %v1189_v16  ;;  %v344_v19 = vpop.f32.mrf.mxu0 }
  0xbe   : > { %v406_v20 = vpop.f32.mrf.mxu1  ;;  %1190 = vpow2.f32 %v448_v17  ;;  %v345_v21 = vadd.f32 %v1551_v1, %v344_v19 }
  0xbf   : > { %1192 = vrcp.f32 %v472_v18  ;;  %v494_v34 = vand.u32 2147483647, %v472_v18  ;;  %v496_v35 = vand.u32 2147483648, %v472_v18  ;;  %vm490_vm2 = vweird.f32 %v472_v18 }
  0xc0   : > { %v401_v22 = vadd.f32 %v400_v5, %v345_v21 }
  0xc1   : > { %vm495_vm4 = vcmp.eq.f32.partialorder %v494_v34, 8.507059e+37  ;;  %v497_v45 = vor.u32 1.1754944e-38, %v496_v35 }
  0xc2   : > { %v435_v23 = vsub.f32 0.0, %v401_v22 }
  0xc4   : > { %v1191_v24 = vpop.eup %1190  ;;  %v450_v25 = vmul.f32 1.442695, %v435_v23 }
  0xc5   : > { %v1193_v26 = vpop.eup %1192  ;;  %v473_v27 = vadd.f32 1.0, %v1191_v24  ;;  %v347_v28 = vpop.f32.mrf.mxu0 }
  0xc6   : > { %v409_v29 = vpop.f32.mrf.mxu1  ;;  %1194 = vpow2.f32 %v450_v25  ;;  %v348_v30 = vadd.f32 %v1551_v1, %v347_v28  ;;  %v486_v31 = vmul.f32 %v1193_v26, %v472_v18  ;;  %vm491_vm1 = vweird.f32 %v1193_v26 }
  0xc7   : > { %1196 = vrcp.f32 %v473_v27  ;;  %vm492_vm3 = vmor %vm490_vm2, %vm491_vm1  ;;  %v509_v52 = vand.u32 2147483647, %v473_v27  ;;  %v511_v53 = vand.u32 2147483648, %v473_v27  ;;  %vm505_vm6 = vweird.f32 %v473_v27 }
  0xc8   : > { %v404_v32 = vadd.f32 %v403_v12, %v348_v30  ;;  %v487_v33 = vsub.f32 1.0, %v486_v31 }
  0xc9   : > { %vm510_vm8 = vcmp.eq.f32.partialorder %v509_v52, 8.507059e+37  ;;  %v512_v63 = vor.u32 1.1754944e-38, %v511_v53 }
  0xca   : > { %v436_v36 = vsub.f32 0.0, %v404_v32  ;;  %v488_v37 = vmul.f32 %v1193_v26, %v487_v33 }
  0xcc   : > { %v1195_v38 = vpop.eup %1194  ;;  %v452_v39 = vmul.f32 1.442695, %v436_v36  ;;  %v489_v40 = vadd.f32 %v1193_v26, %v488_v37 }
  0xcd   : > { %v1197_v41 = vpop.eup %1196  ;;  %v474_v42 = vadd.f32 1.0, %v1195_v38  ;;  %v350_v43 = vpop.f32.mrf.mxu0 }
  0xce   : > { %v412_v44 = vpop.f32.mrf.mxu1  ;;  %1198 = vpow2.f32 %v452_v39  ;;  %v351_v46 = vadd.f32 %v1551_v1, %v350_v43  ;;  %v493_v47 = vsel %vm492_vm3, %v1193_v26, %v489_v40  ;;  %v501_v48 = vmul.f32 %v1197_v41, %v473_v27 }
  0xcf   : > { %1200 = vrcp.f32 %v474_v42  ;;  %v498_v49 = vsel %vm495_vm4, %v497_v45, %v493_v47  ;;  %vm506_vm5 = vweird.f32 %v1197_v41  ;;  %v524_v7 = vand.u32 2147483647, %v474_v42 }
  0xd0   : > { %v407_v50 = vadd.f32 %v406_v20, %v351_v46  ;;  %712 = vmatmul.f32.vlgmr.msra.gmra.mxu2 %v498_v49  ;;  %v502_v51 = vsub.f32 1.0, %v501_v48  ;;  %vm507_vm7 = vmor %vm505_vm6, %vm506_vm5  ;;  %v526_v8 = vand.u32 2147483648, %v474_v42  ;;  %vm520_vm10 = vweird.f32 %v474_v42 }
  0xd1   : > { %vm525_vm12 = vcmp.eq.f32.partialorder %v524_v7, 8.507059e+37 }
  0xd2   : > { %v437_v54 = vsub.f32 0.0, %v407_v50  ;;  %v503_v55 = vmul.f32 %v1197_v41, %v502_v51  ;;  %v527_v18 = vor.u32 1.1754944e-38, %v526_v8 }
  0xd4   : > { %v1199_v56 = vpop.eup %1198  ;;  %v454_v57 = vmul.f32 1.442695, %v437_v54  ;;  %v504_v58 = vadd.f32 %v1197_v41, %v503_v55 }
  0xd5   : > { %v1201_v59 = vpop.eup %1200  ;;  %v475_v60 = vadd.f32 1.0, %v1199_v56  ;;  %v353_v61 = vpop.f32.mrf.mxu0 }
  0xd6   : > { %v415_v62 = vpop.f32.mrf.mxu1  ;;  %1202 = vpow2.f32 %v454_v57  ;;  %v354_v0 = vadd.f32 %v1551_v1, %v353_v61  ;;  %v508_v2 = vsel %vm507_vm7, %v1197_v41, %v504_v58  ;;  %v516_v3 = vmul.f32 %v1201_v59, %v474_v42 }
  0xd7   : > { %1204 = vrcp.f32 %v475_v60  ;;  %v513_v4 = vsel %vm510_vm8, %v512_v63, %v508_v2  ;;  %vm521_vm9 = vweird.f32 %v1201_v59  ;;  %v539_v25 = vand.u32 2147483647, %v475_v60 }
  0xd8   : > { %v410_v5 = vadd.f32 %v409_v29, %v354_v0  ;;  %715 = vmatmul.f32.gmra.mxu2 %v513_v4  ;;  %v517_v6 = vsub.f32 1.0, %v516_v3  ;;  %vm522_vm11 = vmor %vm520_vm10, %vm521_vm9  ;;  %v541_v26 = vand.u32 2147483648, %v475_v60  ;;  %v368_v29 = vpop.f32.mrf.mxu3  ;;  %vm535_vm14 = vweird.f32 %v475_v60 }
  0xd9   : > { %vm540_vm0 = vcmp.eq.f32.partialorder %v539_v25, 8.507059e+37  ;;  %v369_v47 = vadd.f32 %v1551_v1, %v368_v29 }
  0xda   : > { %v438_v9 = vsub.f32 0.0, %v410_v5  ;;  %v518_v10 = vmul.f32 %v1201_v59, %v517_v6  ;;  %v542_v37 = vor.u32 1.1754944e-38, %v541_v26 }
  0xdc   : > { %v1203_v11 = vpop.eup %1202  ;;  %v456_v12 = vmul.f32 1.442695, %v438_v9  ;;  %v519_v13 = vadd.f32 %v1201_v59, %v518_v10 }
  0xdd   : > { %v1205_v14 = vpop.eup %1204  ;;  %v476_v15 = vadd.f32 1.0, %v1203_v11  ;;  %v356_v16 = vpop.f32.mrf.mxu0 }
  0xde   : > { %v1568_v17 = vpop.f32.mrf.mxu1  ;;  %1206 = vpow2.f32 %v456_v12  ;;  %v357_v19 = vadd.f32 %v1551_v1, %v356_v16  ;;  %v523_v20 = vsel %vm522_vm11, %v1201_v59, %v519_v13  ;;  %v531_v21 = vmul.f32 %v1205_v14, %v475_v60 }
  0xdf   : > { %1208 = vrcp.f32 %v476_v15  ;;  %v528_v22 = vsel %vm525_vm12, %v527_v18, %v523_v20  ;;  %vm536_vm13 = vweird.f32 %v1205_v14  ;;  %v556_v45 = vand.u32 2147483648, %v476_v15 }
  0xe0   : > { %v413_v23 = vadd.f32 %v412_v44, %v357_v19  ;;  %718 = vmatmul.f32.gmra.mxu2 %v528_v22  ;;  %v532_v24 = vsub.f32 1.0, %v531_v21  ;;  %vm537_vm15 = vmor %vm535_vm14, %vm536_vm13  ;;  %v554_v44 = vand.u32 2147483647, %v476_v15  ;;  %vm550_vm2 = vweird.f32 %v476_v15  ;;  %v371_v52 = vpop.f32.mrf.mxu3 }
  0xe1   : > { %v557_v57 = vor.u32 1.1754944e-38, %v556_v45  ;;  %v372_v6 = vadd.f32 %v1551_v1, %v371_v52 }
  0xe2   : > { %v439_v27 = vsub.f32 0.0, %v413_v23  ;;  %v533_v28 = vmul.f32 %v1205_v14, %v532_v24  ;;  %vm555_vm4 = vcmp.eq.f32.partialorder %v554_v44, 8.507059e+37 }
  0xe4   : > { %v1207_v30 = vpop.eup %1206  ;;  %v458_v31 = vmul.f32 1.442695, %v439_v27  ;;  %v534_v32 = vadd.f32 %v1205_v14, %v533_v28 }
  0xe5   : > { %v1209_v33 = vpop.eup %1208  ;;  %v1571_v34 = vadd.f32 1.0, %v1207_v30  ;;  %v359_v35 = vpop.f32.mrf.mxu0 }
  0xe6   : > { %v1573_v36 = vpop.f32.mrf.mxu1  ;;  %1210 = vpow2.f32 %v458_v31  ;;  %v360_v38 = vadd.f32 %v1551_v1, %v359_v35  ;;  %v538_v39 = vsel %vm537_vm15, %v1205_v14, %v534_v32  ;;  %v546_v40 = vmul.f32 %v1209_v33, %v476_v15 }
  0xe7   : > { %1212 = vrcp.f32 %v1571_v34  ;;  %v543_v41 = vsel %vm540_vm0, %v542_v37, %v538_v39  ;;  %vm551_vm1 = vweird.f32 %v1209_v33  ;;  %v571_v3 = vand.u32 2147483648, %v1571_v34 }
  0xe8   : > { %v416_v42 = vadd.f32 %v415_v62, %v360_v38  ;;  %721 = vmatmul.f32.gmra.mxu2 %v543_v41  ;;  %v547_v43 = vsub.f32 1.0, %v546_v40  ;;  %vm552_vm3 = vmor %vm550_vm2, %vm551_vm1  ;;  %v569_v8 = vand.u32 2147483647, %v1571_v34  ;;  %vm565_vm6 = vweird.f32 %v1571_v34  ;;  %v374_v19 = vpop.f32.mrf.mxu3 }
  0xe9   : > { %v572_v16 = vor.u32 1.1754944e-38, %v571_v3  ;;  %v375_v26 = vadd.f32 %v1551_v1, %v374_v19 }
  0xea   : > { %v440_v46 = vsub.f32 0.0, %v416_v42  ;;  %v548_v48 = vmul.f32 %v1209_v33, %v547_v43  ;;  %vm570_vm8 = vcmp.eq.f32.partialorder %v569_v8, 8.507059e+37 }
  0xec   : > { %v1211_v49 = vpop.eup %1210  ;;  %v460_v50 = vmul.f32 1.442695, %v440_v46  ;;  %v549_v51 = vadd.f32 %v1209_v33, %v548_v48 }
  0xed   : > { %v1213_v53 = vpop.eup %1212  ;;  %v1578_v54 = vadd.f32 1.0, %v1211_v49  ;;  %v362_v55 = vpop.f32.mrf.mxu0 }
  0xee   : > { %v424_v56 = vpop.f32.mrf.mxu1  ;;  %1214 = vpow2.f32 %v460_v50  ;;  %v363_v58 = vadd.f32 %v1551_v1, %v362_v55  ;;  %v553_v60 = vsel %vm552_vm3, %v1209_v33, %v549_v51  ;;  %v561_v62 = vmul.f32 %v1213_v53, %v1571_v34 }
  0xef   : > { %v425_v59 = vadd.f32 %v424_v56, %v369_v47  ;;  %1216 = vrcp.f32 %v1578_v54  ;;  %v558_v61 = vsel %vm555_vm4, %v557_v57, %v553_v60  ;;  %vm566_vm5 = vweird.f32 %v1213_v53 }
  0xf0   : > { %v419_v63 = vadd.f32 %v1568_v17, %v363_v58  ;;  %724 = vmatmul.f32.gmra.mxu2 %v558_v61  ;;  %v562_v2 = vsub.f32 1.0, %v561_v62  ;;  %vm567_vm7 = vmor %vm565_vm6, %vm566_vm5  ;;  %v584_v27 = vand.u32 2147483647, %v1578_v54  ;;  %v586_v28 = vand.u32 2147483648, %v1578_v54 }
  0xf1   : > { %v443_v0 = vsub.f32 0.0, %v425_v59  ;;  %vm580_vm10 = vweird.f32 %v1578_v54 }
  0xf2   : > { %v441_v4 = vsub.f32 0.0, %v419_v63  ;;  %v563_v7 = vmul.f32 %v1213_v53, %v562_v2  ;;  %vm585_vm12 = vcmp.eq.f32.partialorder %v584_v27, 8.507059e+37  ;;  %v587_v39 = vor.u32 1.1754944e-38, %v586_v28 }
  0xf3   : > { %v466_v5 = vmul.f32 1.442695, %v443_v0 }
  0xf4   : > { %v1215_v9 = vpop.eup %1214  ;;  %v462_v10 = vmul.f32 1.442695, %v441_v4  ;;  %v564_v15 = vadd.f32 %v1213_v53, %v563_v7 }
  0xf5   : > { %1218 = vpow2.f32 %v466_v5  ;;  %v1217_v11 = vpop.eup %1216  ;;  %v1587_v12 = vadd.f32 1.0, %v1215_v9  ;;  %v365_v13 = vpop.f32.mrf.mxu0 }
  0xf6   : > { %v427_v14 = vpop.f32.mrf.mxu1  ;;  %1220 = vpow2.f32 %v462_v10  ;;  %v366_v17 = vadd.f32 %v1551_v1, %v365_v13  ;;  %v576_v20 = vmul.f32 %v1217_v11, %v1578_v54  ;;  %v568_v21 = vsel %vm567_vm7, %v1213_v53, %v564_v15 }
  0xf7   : > { %v428_v18 = vadd.f32 %v427_v14, %v372_v6  ;;  %1222 = vrcp.f32 %v1587_v12  ;;  %v573_v24 = vsel %vm570_vm8, %v572_v16, %v568_v21  ;;  %vm581_vm9 = vweird.f32 %v1217_v11 }
  0xf8   : > { %v422_v22 = vadd.f32 %v1573_v36, %v366_v17  ;;  %v577_v25 = vsub.f32 1.0, %v576_v20  ;;  %727 = vmatmul.f32.gmra.mxu2 %v573_v24  ;;  %vm582_vm11 = vmor %vm580_vm10, %vm581_vm9  ;;  %v601_v46 = vand.u32 2147483648, %v1587_v12  ;;  %v599_v50 = vand.u32 2147483647, %v1587_v12 }
  0xf9   : > { %v444_v23 = vsub.f32 0.0, %v428_v18  ;;  %vm595_vm14 = vweird.f32 %v1587_v12 }
  0xfa   : > { %v442_v30 = vsub.f32 0.0, %v422_v22  ;;  %v578_v32 = vmul.f32 %v1217_v11, %v577_v25  ;;  %v602_v58 = vor.u32 1.1754944e-38, %v601_v46  ;;  %vm600_vm0 = vcmp.eq.f32.partialorder %v599_v50, 8.507059e+37 }
  0xfb   : > { %v1219_v29 = vpop.eup %1218  ;;  %v468_v31 = vmul.f32 1.442695, %v444_v23 }
  0xfc   : > { %v1598_v33 = vadd.f32 1.0, %v1219_v29  ;;  %v1221_v34 = vpop.eup %1220  ;;  %v464_v35 = vmul.f32 1.442695, %v442_v30  ;;  %v579_v36 = vadd.f32 %v1217_v11, %v578_v32 }
  0xfd   : > { %1224 = vpow2.f32 %v468_v31  ;;  %v1223_v37 = vpop.eup %1222  ;;  %v1601_v38 = vadd.f32 1.0, %v1221_v34 }
  0xfe   : > { %1226 = vrcp.f32 %v1598_v33  ;;  %v430_v1 = vpop.f32.mrf.mxu1  ;;  %v583_v41 = vsel %vm582_vm11, %v1217_v11, %v579_v36  ;;  %v591_v42 = vmul.f32 %v1223_v37, %v1587_v12  ;;  %vm596_vm13 = vweird.f32 %v1223_v37 }
  0xff   : > { %1228 = vpow2.f32 %v464_v35  ;;  %v431_v40 = vadd.f32 %v430_v1, %v375_v26  ;;  %v588_v43 = vsel %vm585_vm12, %v587_v39, %v583_v41  ;;  %vm597_vm15 = vmor %vm595_vm14, %vm596_vm13  ;;  %v644_v63 = vand.u32 2147483647, %v1598_v33 }
 0x100   : > { %1230 = vrcp.f32 %v1601_v38  ;;  %v592_v45 = vsub.f32 1.0, %v591_v42  ;;  %730 = vmatmul.f32.gmra.mxu2 %v588_v43  ;;  %v646_v0 = vand.u32 2147483648, %v1598_v33  ;;  %vm640_vm2 = vweird.f32 %v1598_v33 }
 0x101   : > { %v445_v44 = vsub.f32 0.0, %v431_v40  ;;  %v616_v4 = vand.u32 2147483648, %v1601_v38  ;;  %v614_v8 = vand.u32 2147483647, %v1601_v38  ;;  %vm645_vm5 = vcmp.eq.f32.partialorder %v644_v63, 8.507059e+37 }
 0x102   : > { %v593_v49 = vmul.f32 %v1223_v37, %v592_v45  ;;  %v647_v11 = vor.u32 1.1754944e-38, %v646_v0  ;;  %vm610_vm6 = vweird.f32 %v1601_v38 }
 0x103   : > { %v1225_v47 = vpop.eup %1224  ;;  %v470_v48 = vmul.f32 1.442695, %v445_v44  ;;  %v617_v17 = vor.u32 1.1754944e-38, %v616_v4  ;;  %vm615_vm8 = vcmp.eq.f32.partialorder %v614_v8, 8.507059e+37 }
 0x104   : > { %v1227_v51 = vpop.eup %1226  ;;  %v1608_v52 = vadd.f32 1.0, %v1225_v47  ;;  %v594_v54 = vadd.f32 %v1223_v37, %v593_v49 }
 0x105   : > { %v1229_v53 = vpop.eup %1228  ;;  %1232 = vpow2.f32 %v470_v48  ;;  %v636_v55 = vmul.f32 %v1227_v51, %v1598_v33  ;;  %vm641_vm1 = vweird.f32 %v1227_v51 }
 0x106   : > { %v1231_v56 = vpop.eup %1230  ;;  %v1612_v57 = vadd.f32 1.0, %v1229_v53  ;;  %1234 = vrcp.f32 %v1608_v52  ;;  %v598_v59 = vsel %vm597_vm15, %v1223_v37, %v594_v54  ;;  %vm642_vm4 = vmor %vm640_vm2, %vm641_vm1  ;;  %v659_v22 = vand.u32 2147483647, %v1608_v52 }
 0x107   : > { %v637_v60 = vsub.f32 1.0, %v636_v55  ;;  %v606_v61 = vmul.f32 %v1231_v56, %v1601_v38  ;;  %v603_v62 = vsel %vm600_vm0, %v602_v58, %v598_v59  ;;  %vm611_vm3 = vweird.f32 %v1231_v56 }
 0x108   : > { %1236 = vrcp.f32 %v1612_v57  ;;  %733 = vmatmul.f32.gmra.mxu2 %v603_v62  ;;  %vm612_vm7 = vmor %vm610_vm6, %vm611_vm3  ;;  %v661_v23 = vand.u32 2147483648, %v1608_v52  ;;  %vm655_vm10 = vweird.f32 %v1608_v52  ;;  %v631_v26 = vand.u32 2147483648, %v1612_v57 }
 0x109   : > { %v638_v2 = vmul.f32 %v1227_v51, %v637_v60  ;;  %v607_v3 = vsub.f32 1.0, %v606_v61  ;;  %v629_v29 = vand.u32 2147483647, %v1612_v57  ;;  %vm660_vm13 = vcmp.eq.f32.partialorder %v659_v22, 8.507059e+37 }
 0x10a   : > { %v662_v31 = vor.u32 1.1754944e-38, %v661_v23  ;;  %vm625_vm14 = vweird.f32 %v1612_v57  ;;  %v632_v36 = vor.u32 1.1754944e-38, %v631_v26 }
 0x10b   : > { %v1233_v5 = vpop.eup %1232  ;;  %v639_v6 = vadd.f32 %v1227_v51, %v638_v2  ;;  %v608_v7 = vmul.f32 %v1231_v56, %v607_v3  ;;  %vm630_vm0 = vcmp.eq.f32.partialorder %v629_v29, 8.507059e+37 }
 0x10c   : > { %v1235_v9 = vpop.eup %1234  ;;  %v484_v10 = vadd.f32 1.0, %v1233_v5 }
 0x10d   : > { %v643_v12 = vsel %vm642_vm4, %v1227_v51, %v639_v6  ;;  %v609_v13 = vadd.f32 %v1231_v56, %v608_v7  ;;  %v651_v14 = vmul.f32 %v1235_v9, %v1608_v52  ;;  %vm656_vm9 = vweird.f32 %v1235_v9 }
 0x10e   : > { %v1237_v15 = vpop.eup %1236  ;;  %1238 = vrcp.f32 %v484_v10  ;;  %v648_v16 = vsel %vm645_vm5, %v647_v11, %v643_v12  ;;  %vm657_vm12 = vmor %vm655_vm10, %vm656_vm9  ;;  %v676_v39 = vand.u32 2147483648, %v484_v10  ;;  %v674_v41 = vand.u32 2147483647, %v484_v10 }
 0x10f   : > { %742 = vmatmul.f32.vlgmr.msrb.gmra.mxu3 %v648_v16  ;;  %v613_v18 = vsel %vm612_vm7, %v1231_v56, %v609_v13  ;;  %v652_v19 = vsub.f32 1.0, %v651_v14  ;;  %v621_v20 = vmul.f32 %v1237_v15, %v1612_v57  ;;  %vm626_vm11 = vweird.f32 %v1237_v15 }
 0x110   : > { %v618_v21 = vsel %vm615_vm8, %v617_v17, %v613_v18  ;;  %vm627_vm15 = vmor %vm625_vm14, %vm626_vm11  ;;  %vm670_vm2 = vweird.f32 %v484_v10  ;;  %v677_v43 = vor.u32 1.1754944e-38, %v676_v39  ;;  %vm675_vm4 = vcmp.eq.f32.partialorder %v674_v41, 8.507059e+37 }
 0x111   : > { %v653_v24 = vmul.f32 %v1235_v9, %v652_v19  ;;  %v622_v25 = vsub.f32 1.0, %v621_v20  ;;  %736 = vmatmul.f32.gmra.mxu2 %v618_v21  ;;  %vm752_vm5 = vcmask 31744  }
 0x113   : > { %v654_v27 = vadd.f32 %v1235_v9, %v653_v24  ;;  %v623_v28 = vmul.f32 %v1237_v15, %v622_v25 }
 0x114   : > { %v1239_v30 = vpop.eup %1238 }
 0x115   : > { %v658_v32 = vsel %vm657_vm12, %v1235_v9, %v654_v27  ;;  %v624_v33 = vadd.f32 %v1237_v15, %v623_v28  ;;  %v666_v34 = vmul.f32 %v1239_v30, %v484_v10  ;;  %vm671_vm1 = vweird.f32 %v1239_v30 }
 0x116   : > { %v663_v35 = vsel %vm660_vm13, %v662_v31, %v658_v32  ;;  %vm672_vm3 = vmor %vm670_vm2, %vm671_vm1 }
 0x117   : > { %745 = vmatmul.f32.gmra.mxu3 %v663_v35  ;;  %v628_v37 = vsel %vm627_vm15, %v1237_v15, %v624_v33  ;;  %v667_v38 = vsub.f32 1.0, %v666_v34 }
 0x118   : > { %v633_v1 = vsel %vm630_vm0, %v632_v36, %v628_v37 }
 0x119   : > { %v668_v40 = vmul.f32 %v1239_v30, %v667_v38  ;;  %739 = vmatmul.f32.gmra.mxu2 %v633_v1 }
 0x11b   : > { %v669_v42 = vadd.f32 %v1239_v30, %v668_v40 }
 0x11d   : > { %v673_v44 = vsel %vm672_vm3, %v1239_v30, %v669_v42 }
 0x11e   : > { %v678_v45 = vsel %vm675_vm4, %v677_v43, %v673_v44 }
 0x11f   : > { %748 = vmatmul.f32.gmra.mxu3 %v678_v45 }
 0x153   : > { %v713_v46 = vpop.f32.mrf.mxu2 }
 0x154   : > { %753 = vst.msk [vmem:[%s1632_s13] sm:$0xff] %vm752_vm5, %v713_v46 }
 0x15b   : > { %v716_v47 = vpop.f32.mrf.mxu2 }
 0x15c   : > { %754 = vst.msk [vmem:[%s1632_s13 + $0x8] sm:$0xff] %vm752_vm5, %v716_v47 }
 0x163   : > { %v719_v48 = vpop.f32.mrf.mxu2 }
 0x164   : > { %755 = vst.msk [vmem:[%s1632_s13 + $0x10] sm:$0xff] %vm752_vm5, %v719_v48 }
 0x16b   : > { %v722_v49 = vpop.f32.mrf.mxu2 }
 0x16c   : > { %756 = vst.msk [vmem:[%s1632_s13 + $0x18] sm:$0xff] %vm752_vm5, %v722_v49 }
 0x173   : > { %v725_v50 = vpop.f32.mrf.mxu2 }
 0x174   : > { %757 = vst.msk [vmem:[%s1632_s13 + $0x20] sm:$0xff] %vm752_vm5, %v725_v50 }
 0x17b   : > { %v728_v51 = vpop.f32.mrf.mxu2 }
 0x17c   : > { %758 = vst.msk [vmem:[%s1632_s13 + $0x28] sm:$0xff] %vm752_vm5, %v728_v51 }
 0x183   : > { %v731_v52 = vpop.f32.mrf.mxu2 }
 0x184   : > { %759 = vst.msk [vmem:[%s1632_s13 + $0x30] sm:$0xff] %vm752_vm5, %v731_v52 }
 0x18b   : > { %v734_v53 = vpop.f32.mrf.mxu2 }
 0x18c   : > { %760 = vst.msk [vmem:[%s1632_s13 + $0x38] sm:$0xff] %vm752_vm5, %v734_v53 }
 0x192   : > { %v743_v54 = vpop.f32.mrf.mxu3 }
 0x193   : > { %763 = vst.msk [vmem:[%s1632_s13 + $0x50] sm:$0xff] %vm752_vm5, %v743_v54 }
 0x194   : > { %v737_v55 = vpop.f32.mrf.mxu2 }
 0x195   : > { %761 = vst.msk [vmem:[%s1632_s13 + $0x40] sm:$0xff] %vm752_vm5, %v737_v55 }
 0x19a   : > { %v746_v56 = vpop.f32.mrf.mxu3 }
 0x19b   : > { %764 = vst.msk [vmem:[%s1632_s13 + $0x58] sm:$0xff] %vm752_vm5, %v746_v56 }
 0x19c   : > { %v740_v57 = vpop.f32.mrf.mxu2 }
 0x19d   : > { %762 = vst.msk [vmem:[%s1632_s13 + $0x48] sm:$0xff] %vm752_vm5, %v740_v57 }
 0x19f   : > { %772 = sbr.rel (!%p1384_p4) target bundleno = 480 (0x1e0), region = 40 }
 0x1a2   : > { %v749_v58 = vpop.f32.mrf.mxu3 }
 0x1a3   : > { %765 = vst.msk [vmem:[%s1632_s13 + $0x60] sm:$0xff] %vm752_vm5, %v749_v58 }
 0x1a4   : > { %s1768_s15 = smov (!%p775_p8, %s774_s15), 13 }
 0x1a5   : > { %s1051_s24 = sshll.u32 %s1768_s15, 3 }
 0x1a6   : > { %p1054_p9 = scmp.eq.s32.totalorder %s1051_s24, 0 }
 0x1a7   : > { %1240 = sdivrem.u32 (!%p1054_p9), %s1768_s15, 13 }
 0x1a8   : > { %783 = sbr.rel (%p1054_p9) target bundleno = 480 (0x1e0), region = 44 }
 0x1b0   : > { %s1673_s23 = spop.drf %1240 }
 0x1b1   : > { %s1242_s25 = spop.drf %1240  ;;  %p1055_p10 = scmp.le.s32.totalorder %s1673_s23, 0 }
 0x1b2   : > { %s1759_s18 = smov (!%p1055_p10), %s1667_s21  ;;  %s1760_s30 = smov (!%p1055_p10), %s1632_s13 }
 0x1b3   : > { %988 = sbr.rel (%p1055_p10) target bundleno = 454 (0x1c6), region = 120  ;;  %s1682_s26 = smov (!%p1055_p10), 0  }
 0x1b4   : > { %s1684_s12 = smov (!%p1055_p10), 0  }
 0x1b8 LB: >> { %v872_v59 = vld [vmem:[%s1308_s30] sm:$0xff]  ;;  %v874_v60 = vld [vmem:[%s1308_s30 + $0x8] sm:$0xff]  ;;  %v876_v61 = vld [vmem:[%s1308_s30 + $0x10] sm:$0xff]  ;;  %s898_s27 = sadd.s32 1, %s1312_s26  ;;  %s866_s12 = sadd.s32 1, %s1316_s12   ;;  %s1316_s12 = sphi %s1684_s12, %s866_s12   ;;  %s1312_s26 = sphi %s1682_s26, %s1763_s26   ;;  %s1308_s30 = sphi %s1760_s30, %s1762_s30   ;;  %s1304_s18 = sphi %s1759_s18, %s1761_s18  }
 0x1b9   : >> { %873 = vst [vmem:[%s1304_s18] sm:$0xff] %v872_v59  ;;  %v878_v62 = vld [vmem:[%s1308_s30 + $0x18] sm:$0xff]  ;;  %p899_p11 = scmp.ge.s32.totalorder %s898_s27, %s1673_s23  ;;  %v880_v63 = vld [vmem:[%s1308_s30 + $0x20] sm:$0xff]  ;;  %v882_v0 = vld [vmem:[%s1308_s30 + $0x28] sm:$0xff]  ;;  %p865_p12 = scmp.ge.s32.totalorder %s866_s12, %s1673_s23 }
 0x1ba   : >> { %875 = vst [vmem:[%s1304_s18 + $0x8] sm:$0xff] %v874_v60  ;;  %v884_v2 = vld [vmem:[%s1308_s30 + $0x30] sm:$0xff]  ;;  %v886_v3 = vld [vmem:[%s1308_s30 + $0x38] sm:$0xff]  ;;  %v888_v4 = vld [vmem:[%s1308_s30 + $0x40] sm:$0xff] }
 0x1bb   : >> { %877 = vst [vmem:[%s1304_s18 + $0x10] sm:$0xff] %v876_v61  ;;  %s1770_s27 = smov (%p899_p11, %s898_s27), 0  ;;  %v890_v5 = vld [vmem:[%s1308_s30 + $0x48] sm:$0xff]  ;;  %v892_v6 = vld [vmem:[%s1308_s30 + $0x50] sm:$0xff]  ;;  %v894_v7 = vld [vmem:[%s1308_s30 + $0x58] sm:$0xff] }
 0x1bc   : >> { %879 = vst [vmem:[%s1304_s18 + $0x18] sm:$0xff] %v878_v62  ;;  %s901_s28 = smul.u32 104, %s1770_s27  ;;  %v896_v8 = vld [vmem:[%s1308_s30 + $0x60] sm:$0xff]  ;;  %s1763_s26 = smov %s1770_s27 }
 0x1bd   : >> { %881 = vst [vmem:[%s1304_s18 + $0x20] sm:$0xff] %v880_v63 }
 0x1be   : >> { %883 = vst [vmem:[%s1304_s18 + $0x28] sm:$0xff] %v882_v0  ;;  %s903_s29 = scalar_lea.vmem %s1632_s13, %s901_s28 [#allocation2]   ;;  %s904_s5 = scalar_lea.vmem %s1667_s21, %s901_s28  }
 0x1bf   : >> { %885 = vst [vmem:[%s1304_s18 + $0x30] sm:$0xff] %v884_v2  ;;  %s1762_s30 = smov %s903_s29 }
 0x1c0   : >> { %887 = vst [vmem:[%s1304_s18 + $0x38] sm:$0xff] %v886_v3 }
 0x1c1   : >> { %889 = vst [vmem:[%s1304_s18 + $0x40] sm:$0xff] %v888_v4  ;;  %868 = sbr.rel (!%p865_p12) target bundleno = 440 (0x1b8), region = 126 }
 0x1c2   : >> { %891 = vst [vmem:[%s1304_s18 + $0x48] sm:$0xff] %v890_v5 }
 0x1c3   : >> { %893 = vst [vmem:[%s1304_s18 + $0x50] sm:$0xff] %v892_v6 }
 0x1c4   : >> { %895 = vst [vmem:[%s1304_s18 + $0x58] sm:$0xff] %v894_v7 }
 0x1c5   : >> { %897 = vst [vmem:[%s1304_s18 + $0x60] sm:$0xff] %v896_v8  ;;  %s1761_s18 = smov %s904_s5 }
 0x1c6 PF: > { %1243 = sdivrem.u32 %s1768_s15, 13 }
 0x1c7   : > { %s1056_s6 = smul.u32 104, %s1673_s23 }
 0x1c9   : > { %s1738_s7 = scalar_lea.vmem %s1632_s13, %s1056_s6 [#allocation2]   ;;  %s911_s8 = scalar_lea.vmem %s1667_s21, %s1056_s6  }
 0x1cf   : > { %s1244_s9 = spop.drf %1243 }
 0x1d0   : > { %s1245_s10 = spop.drf %1243 }
 0x1d1   : > { %p1058_p13 = scmp.le.s32.totalorder %s1245_s10, 0 }
 0x1d2   : > { %s1318_s11 = smov (!%p1058_p13), %s911_s8   ;;  %s1322_s14 = smov (!%p1058_p13), %s1738_s7  }
 0x1d3   : > { %1002 = sbr.rel (%p1058_p13) target bundleno = 480 (0x1e0), region = 131  ;;  %s1326_s17 = smov (!%p1058_p13), 0  }
 0x1d4   : > { %s1330_s20 = smov (!%p1058_p13), 0  }
 0x1d8 LB: >> { %v921_v9 = vld [vmem:[%s1324_s14] sm:$0xff]  ;;  %s923_s13 = sadd.s32 1, %s1328_s17  ;;  %s915_s20 = sadd.s32 1, %s1332_s20   ;;  %s1332_s20 = sphi %s1330_s20, %s915_s20   ;;  %s1328_s17 = sphi %s1326_s17, %s1327_s17   ;;  %s1324_s14 = sphi %s1322_s14, %s928_s14   ;;  %s1320_s11 = sphi %s1318_s11, %s929_s11  }
 0x1d9   : >> { %922 = vst [vmem:[%s1320_s11] sm:$0xff] %v921_v9  ;;  %p924_p0 = scmp.ge.s32.totalorder %s923_s13, %s1245_s10  ;;  %p914_p1 = scmp.ge.s32.totalorder %s915_s20, %s1245_s10 }
 0x1db   : >> { %s1772_s13 = smov (%p924_p0, %s923_s13), 0  ;;  %917 = sbr.rel (!%p914_p1) target bundleno = 472 (0x1d8), region = 137 }
 0x1dc   : >> { %s1059_s15 = sshll.u32 %s1772_s13, 3  ;;  %s1327_s17 = smov %s1772_s13  }
 0x1dd   : >> { %s928_s14 = scalar_lea.vmem %s1738_s7, %s1059_s15 [#allocation2]   ;;  %s929_s11 = scalar_lea.vmem %s911_s8, %s1059_s15  }
 0x1e0 PF: > { %p11_p2 = scmp.ge.s32.totalorder %s1374_s19, 4   ;;  %s1764_s15 = smov %s1296_s16 }
 0x1e1   : > { %s1765_s16 = smov %s1382_s22  ;;  %s1766_s17 = smov %s1374_s19 }
 0x1e2   :  { %13 = sbr.rel (!%p11_p2) target bundleno = 2 (0x2), region = 148 }

</bundles_post_ra>
